<compile_context>
chip_gen: v6e
topology: v6e:2x2x1
jax: 0.10.0
libtpu: 0.0.40
codegen_flags: <defaults>
</compile_context>

<pallas_src>
import functools

import jax
import jax.numpy as jnp
from jax import lax
from jax.experimental import pallas as pl
from jax.experimental.pallas import tpu as pltpu

_LANES = 128
_SUBLANES = 8
_TARGET_BLOCK_BYTES = 2 * 1024 * 1024   # ~2 MiB of input per grid step
_INNER_ROWS = 512                       # strip-mine chunk (rows) inside a tile


def _round_up(a, b):
    return ((a + b - 1) // b) * b


def _gan_loss_kernel(params_ref, x_ref, o_ref, *, n_valid, tile_m, inner_rows,
                     tiles_per_core, num_tiles, last_ragged, has_overhang):
    c = pl.program_id(0)              # TensorCore-parallel axis
    i = pl.program_id(1)              # reduction axis over row tiles
    t = c * tiles_per_core + i        # logical tile index (may overhang)

    @pl.when(i == 0)
    def _init():
        o_ref[...] = jnp.zeros_like(o_ref)

    target = params_ref[0]            # real/fake label value (SMEM scalar)
    n_inner = tile_m // inner_rows

    def accumulate(masked):
        def step(s, acc):
            start = pl.multiple_of(s * inner_rows, inner_rows)
            xf = x_ref[pl.ds(start, inner_rows), :].astype(jnp.float32)
            # Numerically-stable BCEWithLogits against constant label y:
            #   loss(x) = max(x, 0) - x * y + log(1 + exp(-|x|))
            per = (jnp.maximum(xf, 0.0) - xf * target
                   + jnp.log1p(jnp.exp(-jnp.abs(xf))))
            if masked:
                # Zero out pad / out-of-bounds elements (select, not multiply,
                # so unspecified OOB contents incl. NaN/Inf are safe).
                base = t * (tile_m * _LANES) + start * _LANES
                rid = lax.broadcasted_iota(jnp.int32, (inner_rows, _LANES), 0)
                lid = lax.broadcasted_iota(jnp.int32, (inner_rows, _LANES), 1)
                per = jnp.where(base + rid * _LANES + lid < n_valid, per, 0.0)
            # Fold consecutive sublane groups with plain VPU adds into one
            # vreg-shaped (8, 128) partial; no cross-lane XLU reduce here.
            return acc + per.reshape(inner_rows // _SUBLANES, _SUBLANES,
                                     _LANES).sum(axis=0)

        acc = lax.fori_loop(0, n_inner, step,
                            jnp.zeros((_SUBLANES, _LANES), jnp.float32),
                            unroll=True)
        o_ref[...] += acc[None]

    if last_ragged or has_overhang:
        full_tiles = num_tiles - 1 if last_ragged else num_tiles
        if full_tiles > 0:
            @pl.when(t < full_tiles)
            def _full():
                accumulate(masked=False)
        if last_ragged:
            @pl.when(t == num_tiles - 1)
            def _edge():
                accumulate(masked=True)
        # Over-hanging grid steps (t >= num_tiles) contribute nothing; their
        # BlockSpec index is clamped to a valid tile so the DMA is in-bounds.
    else:
        accumulate(masked=False)


def gan_loss(x, target_is_real, is_disc=False, *, gan_type="vanilla",
             real_label_val=1.0, fake_label_val=0.0, loss_weight=1.0):
    """Pallas equivalent of GANLoss.forward(input, target_is_real, is_disc)."""
    if gan_type != "vanilla":
        raise ValueError(f"{gan_type} not supported")

    n = int(x.size)
    itemsize = jnp.dtype(x.dtype).itemsize
    target = float(real_label_val if target_is_real else fake_label_val)
    # mean over all elements; loss_weight only applied when not is_disc
    scale = (1.0 / n) * (1.0 if is_disc else float(loss_weight))

    rows = pl.cdiv(n, _LANES)

    # Tile sizing: ~2 MiB per grid step, strip-mined in 512-row chunks.
    tile_m_cap = max(_INNER_ROWS,
                     (_TARGET_BLOCK_BYTES // (_LANES * itemsize))
                     // _INNER_ROWS * _INNER_ROWS)
    if rows <= _INNER_ROWS:
        tile_m = _round_up(rows, _SUBLANES)
        inner_rows = tile_m
    else:
        tile_m = min(tile_m_cap, _round_up(rows, _INNER_ROWS))
        inner_rows = _INNER_ROWS
    num_tiles = pl.cdiv(rows, tile_m)

    # Always populate both TensorCores when there is more than one tile
    # ("parallel" leading axis; sharded across TCs on v7x, harmless on 1-TC chips).
    n_par = 2 if num_tiles >= 2 else 1
    tiles_per_core = pl.cdiv(num_tiles, n_par)
    has_overhang = n_par * tiles_per_core > num_tiles
    last_ragged = n != num_tiles * tile_m * _LANES

    flat = x.reshape(-1)                       # native dtype; free reshape
    if rows * _LANES != n:
        # Rare fallback (n % 128 != 0): pad only to the next lane multiple.
        # TODO(synk): handle the <128-element tail wrapper-side to avoid this copy.
        flat = jnp.pad(flat, (0, rows * _LANES - n))
    x2 = flat.reshape(rows, _LANES)

    kernel = functools.partial(
        _gan_loss_kernel, n_valid=n, tile_m=tile_m, inner_rows=inner_rows,
        tiles_per_core=tiles_per_core, num_tiles=num_tiles,
        last_ragged=last_ragged, has_overhang=has_overhang)

    # Clamp the block index so over-hanging grid steps still DMA an in-bounds
    # tile (their contribution is skipped in-kernel).
    def x_index_map(c, i, params_ref):
        return (jnp.minimum(c * tiles_per_core + i, num_tiles - 1), 0)

    partials = pl.pallas_call(
        kernel,
        out_shape=jax.ShapeDtypeStruct((n_par, _SUBLANES, _LANES), jnp.float32),
        grid_spec=pltpu.PrefetchScalarGridSpec(
            num_scalar_prefetch=1,
            grid=(n_par, tiles_per_core),
            in_specs=[pl.BlockSpec((tile_m, _LANES), x_index_map)],
            out_specs=pl.BlockSpec((1, _SUBLANES, _LANES),
                                   lambda c, i, params_ref: (c, 0, 0)),
        ),
        compiler_params=pltpu.CompilerParams(
            dimension_semantics=("parallel", "arbitrary")),
        cost_estimate=pl.CostEstimate(
            flops=6 * n, transcendentals=2 * n,
            bytes_accessed=n * itemsize + n_par * _SUBLANES * _LANES * 4),
    )(jnp.asarray([target], dtype=jnp.float32), x2)

    # Single tiny cross-lane reduction + mean / loss_weight scaling.
    return jnp.sum(partials) * jnp.float32(scale)


def _reference_gan_loss(x, target_is_real, is_disc=False, *,
                        real_label_val=1.0, fake_label_val=0.0,
                        loss_weight=1.0):
    target = real_label_val if target_is_real else fake_label_val
    xf = x.astype(jnp.float32)
    y = jnp.full_like(xf, target)
    per = jnp.maximum(xf, 0.0) - xf * y + jnp.log1p(jnp.exp(-jnp.abs(xf)))
    loss = jnp.mean(per)
    return loss if is_disc else loss * loss_weight


if __name__ == "__main__":
    key = jax.random.PRNGKey(0)
    # Discriminator-style logits, NCHW.
    x = jax.random.normal(key, (2, 4, 16, 16), dtype=jnp.float32)

    # generator-side loss (target real, weighted)
    loss_g = gan_loss(x, target_is_real=True, is_disc=False, loss_weight=1.0)
    # discriminator-side loss on fakes (target fake, unweighted)
    loss_d = gan_loss(x, target_is_real=False, is_disc=True)

    loss_g = jax.block_until_ready(loss_g)
    loss_d = jax.block_until_ready(loss_d)

    ref_g = _reference_gan_loss(x, True, False)
    ref_d = _reference_gan_loss(x, False, True)

    assert jnp.allclose(loss_g, ref_g, rtol=1e-5, atol=1e-5), (loss_g, ref_g)
    assert jnp.allclose(loss_d, ref_d, rtol=1e-5, atol=1e-5), (loss_d, ref_d)

    # Non-multiple-of-128 shape: exercises the lane-pad + masked-tail path.
    x_odd = jax.random.normal(jax.random.PRNGKey(1), (3, 5, 7, 11),
                              dtype=jnp.float32)
    loss_o = jax.block_until_ready(gan_loss(x_odd, True, False, loss_weight=2.0))
    ref_o = _reference_gan_loss(x_odd, True, False, loss_weight=2.0)
    assert jnp.allclose(loss_o, ref_o, rtol=1e-5, atol=1e-5), (loss_o, ref_o)

    # Medium shape: exercises multi-tile strip-mining, the 2-core split with an
    # odd tile count (clamped/ skipped overhang step) and the ragged last tile.
    x_big = jax.random.normal(jax.random.PRNGKey(2), (3, 1, 512, 700),
                              dtype=jnp.float32)
    loss_b = jax.block_until_ready(gan_loss(x_big, False, True))
    ref_b = _reference_gan_loss(x_big, False, True)
    assert jnp.allclose(loss_b, ref_b, rtol=1e-4, atol=1e-5), (loss_b, ref_b)

    print("KERNEL_OK")
</pallas_src>

<mosaic_0001>
module attributes {stable_mosaic.version = 11 : i64} {
  func.func @_gan_loss_kernel(%arg0: i32, %arg1: i32, %arg2: memref<1xf32, #tpu.memory_space<smem>>, %arg3: memref<16x128xf32, #tpu.memory_space<vmem>>, %arg4: memref<1x8x128xf32, #tpu.memory_space<vmem>>) attributes {dimension_semantics = [#tpu.dimension_semantics<parallel>, #tpu.dimension_semantics<arbitrary>], iteration_bounds = array<i64: 1, 1>, scalar_prefetch = 1 : i64, scratch_operands = 0 : i64, tpu.core_type = #tpu.core_type<tc>, window_params = [{transform_indices = @transform_0, window_bounds = array<i64: 16, 128>}, {transform_indices = @transform_1, window_bounds = array<i64: 1, 8, 128>}]} {
    %c0_i32 = arith.constant 0 : i32
    %0 = arith.cmpi eq, %arg1, %c0_i32 : i32
    %1 = arith.extui %0 : i1 to i32
    %c0_i32_0 = arith.constant 0 : i32
    %2 = arith.cmpi ne, %1, %c0_i32_0 : i32
    scf.if %2 {
      %cst_12 = arith.constant 0.000000e+00 : f32
      %27 = vector.broadcast %cst_12 : f32 to vector<1x8x128xf32>
      %c0_13 = arith.constant 0 : index
      %c0_14 = arith.constant 0 : index
      %c0_15 = arith.constant 0 : index
      %28 = vector.load %arg4[%c0_13, %c0_14, %c0_15] : memref<1x8x128xf32, #tpu.memory_space<vmem>>, vector<1x8x128xf32>
      tpu.vector_store %arg4[%c0_13, %c0_14, %c0_15], %27 {strides = array<i32>} : memref<1x8x128xf32, #tpu.memory_space<vmem>>, vector<1x8x128xf32>,
    } else {
    }
    %c0 = arith.constant 0 : index
    %3 = memref.load %arg2[%c0] : memref<1xf32, #tpu.memory_space<smem>>
    %cst = arith.constant 0.000000e+00 : f32
    %4 = vector.broadcast %cst : f32 to vector<8x128xf32>
    %c0_i32_1 = arith.constant 0 : i32
    %c16_i32 = arith.constant 16 : i32
    %5 = arith.muli %c0_i32_1, %c16_i32 : i32
    %6 = tpu.assume_multiple %5, 16 : i32
    %7 = arith.index_cast %6 : i32 to index
    %c0_2 = arith.constant 0 : index
    %8 = vector.load %arg3[%7, %c0_2] : memref<16x128xf32, #tpu.memory_space<vmem>>, vector<16x128xf32>
    %cst_3 = arith.constant 0.000000e+00 : f32
    %9 = vector.broadcast %cst_3 : f32 to vector<16x128xf32>
    %10 = arith.maximumf %8, %9 : vector<16x128xf32>
    %11 = vector.broadcast %3 : f32 to vector<16x128xf32>
    %12 = arith.mulf %8, %11 : vector<16x128xf32>
    %13 = arith.subf %10, %12 : vector<16x128xf32>
    %14 = math.absf %8 : vector<16x128xf32>
    %cst_4 = arith.constant 0.000000e+00 : f32
    %15 = vector.broadcast %cst_4 : f32 to vector<16x128xf32>
    %16 = arith.subf %15, %14 : vector<16x128xf32>
    %17 = math.exp %16 : vector<16x128xf32>
    %18 = math.log1p %17 : vector<16x128xf32>
    %19 = arith.addf %13, %18 : vector<16x128xf32>
    %20 = vector.shape_cast %19 : vector<16x128xf32> to vector<2x8x128xf32>
    %cst_5 = arith.constant dense<0.000000e+00> : vector<8x128xf32>
    %21 = vector.multi_reduction <add>, %20, %cst_5 [0] : vector<2x8x128xf32> to vector<8x128xf32>
    %22 = arith.addf %4, %21 : vector<8x128xf32>
    %c1_i32 = arith.constant 1 : i32
    %c0_6 = arith.constant 0 : index
    %c0_7 = arith.constant 0 : index
    %c0_8 = arith.constant 0 : index
    %23 = vector.load %arg4[%c0_6, %c0_7, %c0_8] : memref<1x8x128xf32, #tpu.memory_space<vmem>>, vector<1x8x128xf32>
    %24 = vector.shape_cast %22 : vector<8x128xf32> to vector<1x8x128xf32>
    %25 = arith.addf %23, %24 : vector<1x8x128xf32>
    %c0_9 = arith.constant 0 : index
    %c0_10 = arith.constant 0 : index
    %c0_11 = arith.constant 0 : index
    %26 = vector.load %arg4[%c0_9, %c0_10, %c0_11] : memref<1x8x128xf32, #tpu.memory_space<vmem>>, vector<1x8x128xf32>
    tpu.vector_store %arg4[%c0_9, %c0_10, %c0_11], %25 {strides = array<i32>} : memref<1x8x128xf32, #tpu.memory_space<vmem>>, vector<1x8x128xf32>,
    return
  }
  func.func @transform_0(%arg0: i32, %arg1: i32, %arg2: memref<1xf32, #tpu.memory_space<smem>>) -> (i32, i32) {
    %c1_i32 = arith.constant 1 : i32
    %0 = arith.muli %arg0, %c1_i32 : i32
    %1 = arith.addi %0, %arg1 : i32
    %c0_i32 = arith.constant 0 : i32
    %2 = arith.minsi %1, %c0_i32 : i32
    %c0_i32_0 = arith.constant 0 : i32
    %c0_i32_1 = arith.constant 0 : i32
    return %2, %c0_i32_0 : i32, i32
  }
  func.func @transform_1(%arg0: i32, %arg1: i32, %arg2: memref<1xf32, #tpu.memory_space<smem>>) -> (i32, i32, i32) {
    %c0_i32 = arith.constant 0 : i32
    %c0_i32_0 = arith.constant 0 : i32
    %c0_i32_1 = arith.constant 0 : i32
    return %arg0, %c0_i32, %c0_i32_0 : i32, i32, i32
  }
}

</mosaic_0001>

<bundles_post_ra>
// kernel: tpu_custom_call.1
= control target key start
LH: loop header
LB: loop body
LE: loop exit
PB: predicated region body
PF: predicated region fallthrough
CT: control target
= control target key end

     0   :  { %8 = vsyncpa [#allocation5], 0  ;;  %s185_s0 = inlined_call_operand.<no memory space> [shape: f32[1], index: 0, kind: input, shape index: {}]   ;;  %s186_s1 = inlined_call_operand.hbm [shape: f32[16,128], index: 1, kind: input, shape index: {}]   ;;  %s187_s2 = inlined_call_operand.hbm [shape: f32[1,8,128], index: 2, kind: output, shape index: {}]  }
   0x1   :  { %9 = vsyncpa [#allocation6], 0  ;;  %s157_s9 = smov [#allocation4]  }
   0x2   :  { %s21_s10 = sshll.u32 %s157_s9, 4  ;;  %s22_s10 = int_to_ptr.vmem [resolvable:$true] %s21_s10 }
   0x3   :  { %s121_s11 = scalar_lea.vmem %s22_s10, 256  ;;  %p126_p1 = scmp.lt.s32.totalorder %s22_s10, %s22_s10 }
   0x4   :  { %p122_p0 = scmp.ne.s32.totalorder %s22_s10, %s121_s11  ;;  %p127_p2 = scmp.lt.s32.totalorder %s121_s11, %s121_s11 }
   0x6   :  { %p128_p3 = por %p127_p2, %p126_p1 }
   0x8   :  { %p129_p4 = pnand %p128_p3, %p122_p0 }
   0xa   :  { %132 = shalt.err (!%p129_p4)
}
   0xb   :  { %s158_s12 = smov 128   ;;  %s159_s13 = smov 8  }
   0xc   :  { %27 = dma.hbm_to_vmem [thread:$0]  %s186_s1, 256, %s22_s10, [#allocation5], %s158_s12, %s158_s12, %s159_s13  }
   0xd   :  { %153 = dma.done.wait [#allocation5], 256  }
   0xe   :  { %154 = vsyncadd [#allocation5], 4294967040  ;;  %v41_v0 = vld [vmem:[#allocation4] sm:$0xff]  ;;  %v42_v1 = vld [vmem:[#allocation4 + $0x8] sm:$0xff]  ;;  %v45_v14 = vstv %s185_s0  ;;  %s160_s0 = smov [#allocation7]  }
   0xf   :  { %v50_v2 = vand.u32 2147483647, %v41_v0  ;;  %v51_v3 = vand.u32 2147483647, %v42_v1  ;;  %v43_v16 = vmax.f32 %v41_v0, 0.0  ;;  %v46_v17 = vmul.f32 %v45_v14, %v41_v0  ;;  %s89_s17 = sshll.u32 %s160_s0, 4  ;;  %s90_s17 = int_to_ptr.vmem [resolvable:$true] %s89_s17 }
  0x10   :  { %v44_v20 = vmax.f32 %v42_v1, 0.0  ;;  %v47_v21 = vmul.f32 %v45_v14, %v42_v1  ;;  %s133_s18 = scalar_lea.vmem %s90_s17, 128  ;;  %p138_p6 = scmp.lt.s32.totalorder %s90_s17, %s90_s17 }
  0x11   :  { %v52_v4 = vsub.f32 0.0, %v50_v2  ;;  %v53_v5 = vsub.f32 0.0, %v51_v3  ;;  %v48_v25 = vsub.f32 %v43_v16, %v46_v17  ;;  %p134_p5 = scmp.ne.s32.totalorder %s90_s17, %s133_s18  ;;  %p139_p7 = scmp.lt.s32.totalorder %s133_s18, %s133_s18 }
  0x12   :  { %v49_v28 = vsub.f32 %v44_v20, %v47_v21 }
  0x13   :  { %v54_v6 = vmul.f32 1.442695, %v52_v4  ;;  %v56_v7 = vmul.f32 1.442695, %v53_v5  ;;  %p140_p8 = por %p139_p7, %p138_p6 }
  0x15   :  { %105 = vpow2.f32 %v54_v6  ;;  %p141_p9 = pnand %p140_p8, %p134_p5 }
  0x16   :  { %107 = vpow2.f32 %v56_v7 }
  0x22   :  { %v106_v8 = vpop.eup %105 }
  0x23   :  { %v108_v9 = vpop.eup %107  ;;  %v58_v10 = vadd.f32 1.0, %v106_v8  ;;  %v61_v12 = vmul.f32 -0.5, %v106_v8  ;;  %v64_v18 = vand.u32 2147483647, %v106_v8 }
  0x24   :  { %v67_v11 = vadd.f32 1.0, %v108_v9  ;;  %v70_v13 = vmul.f32 -0.5, %v108_v9  ;;  %v73_v22 = vand.u32 2147483647, %v108_v9 }
  0x25   :  { %109 = vlog2.f32 %v58_v10  ;;  %v62_v15 = vadd.f32 1.0, %v61_v12  ;;  %vm65_vm0 = vcmp.lt.f32.partialorder %v64_v18, 0.0004427343 }
  0x26   :  { %111 = vlog2.f32 %v67_v11  ;;  %v71_v19 = vadd.f32 1.0, %v70_v13  ;;  %vm74_vm1 = vcmp.lt.f32.partialorder %v73_v22, 0.0004427343 }
  0x27   :  { %v63_v23 = vmul.f32 %v106_v8, %v62_v15 }
  0x28   :  { %v72_v26 = vmul.f32 %v108_v9, %v71_v19 }
  0x32   :  { %v110_v24 = vpop.eup %109 }
  0x33   :  { %v112_v27 = vpop.eup %111  ;;  %v60_v29 = vmul.f32 0.6931472, %v110_v24 }
  0x34   :  { %v69_v30 = vmul.f32 0.6931472, %v112_v27 }
  0x35   :  { %v66_v31 = vsel %vm65_vm0, %v63_v23, %v60_v29 }
  0x36   :  { %v75_v32 = vsel %vm74_vm1, %v72_v26, %v69_v30  ;;  %v76_v33 = vadd.f32 %v66_v31, %v48_v25 }
  0x37   :  { %v77_v34 = vadd.f32 %v75_v32, %v49_v28 }
  0x39   :  { %v78_v35 = vadd.f32 %v77_v34, %v76_v33 }
  0x3b   :  { %82 = vst [vmem:[#allocation7] sm:$0xff] %v78_v35 }
  0x3c   :  { %144 = shalt.err (!%p141_p9)
}
  0x3d   :  { %92 = dma.vmem_to_hbm [thread:$0]  %s90_s17, 128, %s187_s2, [#allocation6]  }
  0x3e   :  { %155 = dma.done.wait [#allocation6], 128  }
  0x3f   :  { %156 = vsyncadd [#allocation6], 4294967168 }
  0x40   :  { %96 = vsyncpa [#allocation5], 1 }
  0x41   :  { %97 = vsyncpa [#allocation6], 1 }

</bundles_post_ra>
